<compile_context>
chip_gen: v7x
topology: tpu7x:2x2x1
jax: 0.10.0
libtpu: 0.0.40
codegen_flags: <defaults>
</compile_context>

<pallas_src>
import functools

import jax
import jax.numpy as jnp
from jax.experimental import pallas as pl
from jax.experimental.pallas import tpu as pltpu


def encoder_kernel(u_ref, y_ref,
                   wa_u_ref, wa_y_ref, ba_ref,   # fused [w1 | ws] split by input
                   w2_ref, b2_ref,               # hidden layer 2
                   w3_ref, b3_ref,               # output layer of res branch
                   out_ref, *, hidden):
    # Fused stage 1: columns [0:H) are hidden-layer-1 pre-activation,
    # columns [H:H+nx) are the linear skip branch.  Single MXU output tile.
    t = (jnp.dot(u_ref[...], wa_u_ref[...], preferred_element_type=jnp.float32)
         + jnp.dot(y_ref[...], wa_y_ref[...], preferred_element_type=jnp.float32)
         + ba_ref[...])                                           # (TB, H+nx) f32

    h = jnp.tanh(t[:, :hidden])                                   # f32 tanh (EUP)
    skip = t[:, hidden:]                                          # (TB, nx) f32

    h = jnp.tanh(jnp.dot(h.astype(jnp.bfloat16), w2_ref[...],
                         preferred_element_type=jnp.float32) + b2_ref[...])
    nl = jnp.dot(h.astype(jnp.bfloat16), w3_ref[...],
                 preferred_element_type=jnp.float32) + b3_ref[...]

    out_ref[...] = skip + nl                                      # f32 epilogue


def pack_params(raw_params, n_u):
    """Pack f32 (in,out)/(1,out) weights into the kernel layout.

    Returns (wa_u, wa_y, ba, w2, b2, w3, b3) with matmul operands in bf16 and
    biases in f32.  wa_* = [w1 | ws] split row-wise at the u/y boundary.
    """
    ws, bs, w1, b1, w2, b2, w3, b3 = raw_params
    wa = jnp.concatenate([w1, ws], axis=1)            # (n_in, H + nx)
    ba = jnp.concatenate([b1, bs], axis=1)            # (1,    H + nx)
    return (wa[:n_u].astype(jnp.bfloat16),
            wa[n_u:].astype(jnp.bfloat16),
            ba.astype(jnp.float32),
            w2.astype(jnp.bfloat16), b2.astype(jnp.float32),
            w3.astype(jnp.bfloat16), b3.astype(jnp.float32))


def default_encoder_net_pallas(upast, ypast, packed_params, *, batch_tile=512):
    """upast: (B, nb, *nu), ypast: (B, na, *ny)  ->  (B, nx) float32."""
    B = upast.shape[0]
    u = upast.reshape(B, -1).astype(jnp.bfloat16)     # reshape is a view; cast
    y = ypast.reshape(B, -1).astype(jnp.bfloat16)     # halves HBM read bytes

    wa_u, wa_y, ba, w2, b2, w3, b3 = packed_params
    n_u = wa_u.shape[0]
    n_y = wa_y.shape[0]
    H = w2.shape[0]
    nx = wa_u.shape[1] - H
    n_in = n_u + n_y

    # Batch tiling: one tile if B is small, otherwise TB=batch_tile (mult. of 8)
    # with the last tile padded so every block is aligned.
    if B <= batch_tile:
        TB, Bp = B, B
    else:
        TB = batch_tile
        Bp = -(-B // TB) * TB
        if Bp != B:
            u = jnp.pad(u, ((0, Bp - B), (0, 0)))
            y = jnp.pad(y, ((0, Bp - B), (0, 0)))
    grid = (Bp // TB,)

    flops = 2 * Bp * (n_in * (H + nx) + H * H + H * nx)
    transcendentals = 2 * Bp * H
    bytes_accessed = (int(u.size) + int(y.size)) * 2 + Bp * nx * 4 + sum(
        int(p.size) * p.dtype.itemsize for p in packed_params)

    def weight_spec(a):
        # Full-array block, constant index -> stays resident in VMEM (no re-DMA).
        return pl.BlockSpec(a.shape, lambda i: (0, 0))

    out = pl.pallas_call(
        functools.partial(encoder_kernel, hidden=H),
        out_shape=jax.ShapeDtypeStruct((Bp, nx), jnp.float32),
        grid_spec=pltpu.PrefetchScalarGridSpec(
            num_scalar_prefetch=0,
            grid=grid,
            in_specs=[
                pl.BlockSpec((TB, n_u), lambda i: (i, 0)),
                pl.BlockSpec((TB, n_y), lambda i: (i, 0)),
                weight_spec(wa_u), weight_spec(wa_y), weight_spec(ba),
                weight_spec(w2), weight_spec(b2),
                weight_spec(w3), weight_spec(b3),
            ],
            out_specs=pl.BlockSpec((TB, nx), lambda i: (i, 0)),
        ),
        compiler_params=pltpu.CompilerParams(
            dimension_semantics=("parallel",),
            vmem_limit_bytes=32 * 1024 * 1024,
        ),
        cost_estimate=pl.CostEstimate(
            flops=flops,
            transcendentals=transcendentals,
            bytes_accessed=bytes_accessed,
        ),
    )(u, y, wa_u, wa_y, ba, w2, b2, w3, b3)

    return out[:B] if Bp != B else out


def init_params(key, n_in, nx, hidden):
    """Deterministic synthetic parameters (shapes match simple_res_net)."""
    ks = jax.random.split(key, 8)

    def lin(kw, kb, fan_in, fan_out):
        lim = 1.0 / jnp.sqrt(fan_in)
        w = jax.random.uniform(kw, (fan_in, fan_out), jnp.float32, -lim, lim)
        b = jax.random.uniform(kb, (1, fan_out), jnp.float32, -lim, lim)
        return w, b

    ws, bs = lin(ks[0], ks[1], n_in, nx)        # net_lin (skip)
    w1, b1 = lin(ks[2], ks[3], n_in, hidden)    # feed_forward_nn layer 1
    w2, b2 = lin(ks[4], ks[5], hidden, hidden)  # feed_forward_nn layer 2
    w3, b3 = lin(ks[6], ks[7], hidden, nx)      # feed_forward_nn output
    return (ws, bs, w1, b1, w2, b2, w3, b3)


def reference_f32(upast, ypast, raw_params):
    B = upast.shape[0]
    x = jnp.concatenate([upast.reshape(B, -1), ypast.reshape(B, -1)], axis=1)
    ws, bs, w1, b1, w2, b2, w3, b3 = raw_params
    skip = x @ ws + bs
    h = jnp.tanh(x @ w1 + b1)
    h = jnp.tanh(h @ w2 + b2)
    return skip + (h @ w3 + b3)


def reference_bf16_mxu(upast, ypast, raw_params):
    """Emulates kernel numerics: bf16 MXU operands, f32 accumulate + epilogue."""
    B = upast.shape[0]
    r = lambda a: a.astype(jnp.bfloat16).astype(jnp.float32)
    x = r(jnp.concatenate([upast.reshape(B, -1), ypast.reshape(B, -1)], axis=1))
    ws, bs, w1, b1, w2, b2, w3, b3 = raw_params
    skip = x @ r(ws) + bs
    h = jnp.tanh(x @ r(w1) + b1)
    h = jnp.tanh(r(h) @ r(w2) + b2)
    return skip + (r(h) @ r(w3) + b3)


if __name__ == "__main__":
    # small shapes: batch=2, nb=na=8 past steps, nu=ny=4 channels,
    # hidden nodes=64 (module default n_nodes_per_layer), state dim nx=8
    B, nb, nu, na, ny = 2, 8, 4, 8, 4
    hidden, nx = 64, 8
    n_in = nb * nu + na * ny  # 64

    key = jax.random.PRNGKey(0)
    k_u, k_y, k_p = jax.random.split(key, 3)
    upast = jax.random.normal(k_u, (B, nb, nu), jnp.float32)
    ypast = jax.random.normal(k_y, (B, na, ny), jnp.float32)
    raw_params = init_params(k_p, n_in, nx, hidden)
    packed = pack_params(raw_params, n_u=nb * nu)

    out = default_encoder_net_pallas(upast, ypast, packed)
    out = jax.block_until_ready(out)
    assert out.shape == (B, nx)

    # tight check vs a reference with matching (bf16-MXU, f32-accumulate) numerics
    ref_bf = reference_bf16_mxu(upast, ypast, raw_params)
    assert jnp.allclose(out, ref_bf, atol=5e-3, rtol=5e-3), "mismatch vs bf16-MXU reference"

    # loose check vs the pure-f32 PyTorch-equivalent math
    ref_f32 = reference_f32(upast, ypast, raw_params)
    assert jnp.allclose(out, ref_f32, atol=1.5e-1, rtol=1.5e-1), "mismatch vs f32 reference"

    print("KERNEL_OK")
</pallas_src>

<mosaic_0001>
module attributes {stable_mosaic.version = 11 : i64} {
  func.func @encoder_kernel(%arg0: i32, %arg1: memref<2x32xbf16, #tpu.memory_space<vmem>>, %arg2: memref<2x32xbf16, #tpu.memory_space<vmem>>, %arg3: memref<32x72xbf16, #tpu.memory_space<vmem>>, %arg4: memref<32x72xbf16, #tpu.memory_space<vmem>>, %arg5: memref<1x72xf32, #tpu.memory_space<vmem>>, %arg6: memref<64x64xbf16, #tpu.memory_space<vmem>>, %arg7: memref<1x64xf32, #tpu.memory_space<vmem>>, %arg8: memref<64x8xbf16, #tpu.memory_space<vmem>>, %arg9: memref<1x8xf32, #tpu.memory_space<vmem>>, %arg10: memref<2x8xf32, #tpu.memory_space<vmem>>) attributes {dimension_semantics = [#tpu.dimension_semantics<parallel>], iteration_bounds = array<i64: 1>, scalar_prefetch = 0 : i64, scratch_operands = 0 : i64, tpu.core_type = #tpu.core_type<tc>, window_params = [{transform_indices = @transform_0, window_bounds = array<i64: 2, 32>}, {transform_indices = @transform_1, window_bounds = array<i64: 2, 32>}, {pipeline_mode = #tpu.pipeline_mode<synchronous>, transform_indices = @transform_2, window_bounds = array<i64: 32, 72>}, {pipeline_mode = #tpu.pipeline_mode<synchronous>, transform_indices = @transform_3, window_bounds = array<i64: 32, 72>}, {pipeline_mode = #tpu.pipeline_mode<synchronous>, transform_indices = @transform_4, window_bounds = array<i64: 1, 72>}, {pipeline_mode = #tpu.pipeline_mode<synchronous>, transform_indices = @transform_5, window_bounds = array<i64: 64, 64>}, {pipeline_mode = #tpu.pipeline_mode<synchronous>, transform_indices = @transform_6, window_bounds = array<i64: 1, 64>}, {pipeline_mode = #tpu.pipeline_mode<synchronous>, transform_indices = @transform_7, window_bounds = array<i64: 64, 8>}, {pipeline_mode = #tpu.pipeline_mode<synchronous>, transform_indices = @transform_8, window_bounds = array<i64: 1, 8>}, {transform_indices = @transform_9, window_bounds = array<i64: 2, 8>}]} {
    %c0 = arith.constant 0 : index
    %c0_0 = arith.constant 0 : index
    %0 = vector.load %arg1[%c0, %c0_0] : memref<2x32xbf16, #tpu.memory_space<vmem>>, vector<2x32xbf16>
    %c0_1 = arith.constant 0 : index
    %c0_2 = arith.constant 0 : index
    %1 = vector.load %arg3[%c0_1, %c0_2] : memref<32x72xbf16, #tpu.memory_space<vmem>>, vector<32x72xbf16>
    %cst = arith.constant dense<0.000000e+00> : vector<2x72xf32>
    %2 = tpu.matmul %0, %1, %cst {dimension_numbers = #tpu.dot_dimension_numbers<[1], [0], [0], [1], [0, 0, 1, 1], [], []>} : vector<2x32xbf16>, vector<32x72xbf16>, vector<2x72xf32> -> vector<2x72xf32>
    %c0_3 = arith.constant 0 : index
    %c0_4 = arith.constant 0 : index
    %3 = vector.load %arg2[%c0_3, %c0_4] : memref<2x32xbf16, #tpu.memory_space<vmem>>, vector<2x32xbf16>
    %c0_5 = arith.constant 0 : index
    %c0_6 = arith.constant 0 : index
    %4 = vector.load %arg4[%c0_5, %c0_6] : memref<32x72xbf16, #tpu.memory_space<vmem>>, vector<32x72xbf16>
    %cst_7 = arith.constant dense<0.000000e+00> : vector<2x72xf32>
    %5 = tpu.matmul %3, %4, %cst_7 {dimension_numbers = #tpu.dot_dimension_numbers<[1], [0], [0], [1], [0, 0, 1, 1], [], []>} : vector<2x32xbf16>, vector<32x72xbf16>, vector<2x72xf32> -> vector<2x72xf32>
    %6 = arith.addf %2, %5 : vector<2x72xf32>
    %c0_8 = arith.constant 0 : index
    %c0_9 = arith.constant 0 : index
    %7 = vector.load %arg5[%c0_8, %c0_9] : memref<1x72xf32, #tpu.memory_space<vmem>>, vector<1x72xf32>
    %8 = vector.broadcast %7 : vector<1x72xf32> to vector<2x72xf32>
    %9 = arith.addf %6, %8 : vector<2x72xf32>
    %10 = vector.extract_strided_slice %9 {offsets = [0, 0], sizes = [2, 64], strides = [1, 1]} : vector<2x72xf32> to vector<2x64xf32>
    %11 = math.tanh %10 : vector<2x64xf32>
    %12 = vector.extract_strided_slice %9 {offsets = [0, 64], sizes = [2, 8], strides = [1, 1]} : vector<2x72xf32> to vector<2x8xf32>
    %13 = arith.truncf %11 : vector<2x64xf32> to vector<2x64xbf16>
    %c0_10 = arith.constant 0 : index
    %c0_11 = arith.constant 0 : index
    %14 = vector.load %arg6[%c0_10, %c0_11] : memref<64x64xbf16, #tpu.memory_space<vmem>>, vector<64x64xbf16>
    %cst_12 = arith.constant dense<0.000000e+00> : vector<2x64xf32>
    %15 = tpu.matmul %13, %14, %cst_12 {dimension_numbers = #tpu.dot_dimension_numbers<[1], [0], [0], [1], [0, 0, 1, 1], [], []>} : vector<2x64xbf16>, vector<64x64xbf16>, vector<2x64xf32> -> vector<2x64xf32>
    %c0_13 = arith.constant 0 : index
    %c0_14 = arith.constant 0 : index
    %16 = vector.load %arg7[%c0_13, %c0_14] : memref<1x64xf32, #tpu.memory_space<vmem>>, vector<1x64xf32>
    %17 = vector.broadcast %16 : vector<1x64xf32> to vector<2x64xf32>
    %18 = arith.addf %15, %17 : vector<2x64xf32>
    %19 = math.tanh %18 : vector<2x64xf32>
    %20 = arith.truncf %19 : vector<2x64xf32> to vector<2x64xbf16>
    %c0_15 = arith.constant 0 : index
    %c0_16 = arith.constant 0 : index
    %21 = vector.load %arg8[%c0_15, %c0_16] : memref<64x8xbf16, #tpu.memory_space<vmem>>, vector<64x8xbf16>
    %cst_17 = arith.constant dense<0.000000e+00> : vector<2x8xf32>
    %22 = tpu.matmul %20, %21, %cst_17 {dimension_numbers = #tpu.dot_dimension_numbers<[1], [0], [0], [1], [0, 0, 1, 1], [], []>} : vector<2x64xbf16>, vector<64x8xbf16>, vector<2x8xf32> -> vector<2x8xf32>
    %c0_18 = arith.constant 0 : index
    %c0_19 = arith.constant 0 : index
    %23 = vector.load %arg9[%c0_18, %c0_19] : memref<1x8xf32, #tpu.memory_space<vmem>>, vector<1x8xf32>
    %24 = vector.broadcast %23 : vector<1x8xf32> to vector<2x8xf32>
    %25 = arith.addf %22, %24 : vector<2x8xf32>
    %26 = arith.addf %12, %25 : vector<2x8xf32>
    %c0_20 = arith.constant 0 : index
    %c0_21 = arith.constant 0 : index
    %27 = vector.load %arg10[%c0_20, %c0_21] : memref<2x8xf32, #tpu.memory_space<vmem>>, vector<2x8xf32>
    tpu.vector_store %arg10[%c0_20, %c0_21], %26 {strides = array<i32>} : memref<2x8xf32, #tpu.memory_space<vmem>>, vector<2x8xf32>,
    return
  }
  func.func @transform_0(%arg0: i32) -> (i32, i32) {
    %c0_i32 = arith.constant 0 : i32
    %c0_i32_0 = arith.constant 0 : i32
    return %arg0, %c0_i32 : i32, i32
  }
  func.func @transform_1(%arg0: i32) -> (i32, i32) {
    %c0_i32 = arith.constant 0 : i32
    %c0_i32_0 = arith.constant 0 : i32
    return %arg0, %c0_i32 : i32, i32
  }
  func.func @transform_2(%arg0: i32) -> (i32, i32) {
    %c0_i32 = arith.constant 0 : i32
    %c0_i32_0 = arith.constant 0 : i32
    %c0_i32_1 = arith.constant 0 : i32
    return %c0_i32, %c0_i32_0 : i32, i32
  }
  func.func @transform_3(%arg0: i32) -> (i32, i32) {
    %c0_i32 = arith.constant 0 : i32
    %c0_i32_0 = arith.constant 0 : i32
    %c0_i32_1 = arith.constant 0 : i32
    return %c0_i32, %c0_i32_0 : i32, i32
  }
  func.func @transform_4(%arg0: i32) -> (i32, i32) {
    %c0_i32 = arith.constant 0 : i32
    %c0_i32_0 = arith.constant 0 : i32
    %c0_i32_1 = arith.constant 0 : i32
    return %c0_i32, %c0_i32_0 : i32, i32
  }
  func.func @transform_5(%arg0: i32) -> (i32, i32) {
    %c0_i32 = arith.constant 0 : i32
    %c0_i32_0 = arith.constant 0 : i32
    %c0_i32_1 = arith.constant 0 : i32
    return %c0_i32, %c0_i32_0 : i32, i32
  }
  func.func @transform_6(%arg0: i32) -> (i32, i32) {
    %c0_i32 = arith.constant 0 : i32
    %c0_i32_0 = arith.constant 0 : i32
    %c0_i32_1 = arith.constant 0 : i32
    return %c0_i32, %c0_i32_0 : i32, i32
  }
  func.func @transform_7(%arg0: i32) -> (i32, i32) {
    %c0_i32 = arith.constant 0 : i32
    %c0_i32_0 = arith.constant 0 : i32
    %c0_i32_1 = arith.constant 0 : i32
    return %c0_i32, %c0_i32_0 : i32, i32
  }
  func.func @transform_8(%arg0: i32) -> (i32, i32) {
    %c0_i32 = arith.constant 0 : i32
    %c0_i32_0 = arith.constant 0 : i32
    %c0_i32_1 = arith.constant 0 : i32
    return %c0_i32, %c0_i32_0 : i32, i32
  }
  func.func @transform_9(%arg0: i32) -> (i32, i32) {
    %c0_i32 = arith.constant 0 : i32
    %c0_i32_0 = arith.constant 0 : i32
    return %arg0, %c0_i32 : i32, i32
  }
}

</mosaic_0001>

<bundles_post_ra>
// kernel: tpu_custom_call.1
= control target key start
LH: loop header
LB: loop body
LE: loop exit
PB: predicated region body
PF: predicated region fallthrough
CT: control target
= control target key end

     0   :  { %14 = vsyncpa [#allocation3], 0  ;;  %s652_s0 = inlined_call_operand.vmem [shape: bf16[2,32], index: 0, kind: input, shape index: {}]   ;;  %s653_s1 = inlined_call_operand.vmem [shape: bf16[2,32], index: 1, kind: input, shape index: {}]   ;;  %s654_s2 = inlined_call_operand.vmem [shape: bf16[32,72], index: 2, kind: input, shape index: {}]   ;;  %s655_s3 = inlined_call_operand.hbm [shape: bf16[32,72], index: 3, kind: input, shape index: {}]   ;;  %s656_s4 = inlined_call_operand.vmem [shape: f32[1,72], index: 4, kind: input, shape index: {}]   ;;  %s657_s5 = inlined_call_operand.vmem [shape: bf16[64,64], index: 5, kind: input, shape index: {}]   ;;  %s658_s6 = inlined_call_operand.vmem [shape: f32[1,64], index: 6, kind: input, shape index: {}]   ;;  %s659_s7 = inlined_call_operand.vmem [shape: bf16[64,8], index: 7, kind: input, shape index: {}]   ;;  %s660_s8 = inlined_call_operand.vmem [shape: f32[1,8], index: 8, kind: input, shape index: {}]   ;;  %s661_s9 = inlined_call_operand.hbm [shape: f32[2,8], index: 9, kind: output, shape index: {}]  }
   0x1   :  { %15 = vsyncpa [#allocation4], 0  ;;  %s517_s30 = smov [#allocation2]   ;;  %s469_s13 = scalar_lea.hbm %s655_s3, 256 }
   0x2   :  { %s27_s10 = sshll.u32 %s517_s30, 4  ;;  %p470_p0 = scmp.ne.s32.totalorder %s655_s3, %s469_s13  ;;  %s28_s10 = int_to_ptr.vmem [resolvable:$true] %s27_s10 }
   0x3   :  { %p473_p1 = scmp.lt.u32.totalorder %s469_s13, %s655_s3 }
   0x5   :  { %p475_p2 = pnand %p473_p1, %p470_p0 }
   0x7   :  { %478 = shalt.err (!%p475_p2)
}
   0x8   :  { %s479_s18 = scalar_lea.vmem %s28_s10, 256  ;;  %p484_p4 = scmp.lt.s32.totalorder %s28_s10, %s28_s10 }
   0x9   :  { %p480_p3 = scmp.ne.s32.totalorder %s28_s10, %s479_s18  ;;  %p485_p5 = scmp.lt.s32.totalorder %s479_s18, %s479_s18 }
   0xb   :  { %p486_p6 = por %p485_p5, %p484_p4 }
   0xd   :  { %p487_p7 = pnand %p486_p6, %p480_p3 }
   0xf   :  { %490 = shalt.err (!%p487_p7)
}
  0x10   :  { %s518_s19 = smov 64   ;;  %s519_s20 = smov 4  }
  0x11   :  { %33 = dma.hbm_to_vmem [thread:$0]  %s655_s3, 256, %s28_s10, [#allocation3], %s518_s19, %s518_s19, %s519_s20  }
  0x12   :  { %513 = dma.done.wait [#allocation3], 256  }
  0x13   :  { %514 = vsyncadd [#allocation3], 4294967040  ;;  %v520_v0 = vmov 0.0   ;;  %vm521_vm0 = vmmov 0   ;;  %v453_v1 = vld [vmem:[#allocation2] sm:$0xff]   ;;  %v455_v3 = vld [vmem:[#allocation2 + $0x8] sm:$0xff]  }
  0x14   :  { %407 = vmatprep.subr.bf16.mxu0 %v520_v0  ;;  %415 = vmatprep.subr.bf16.mxu1 %v520_v0  ;;  %v454_v2 = vld [vmem:[%s654_s2] sm:$0xff]   ;;  %v456_v4 = vld [vmem:[%s654_s2 + $0x8] sm:$0xff]   ;;  %vm70_vm1 = vcmask 261120   ;;  %v459_v9 = vld [vmem:[%s657_s5 + $0x10] sm:$0xff]   ;;  %vm218_vm2 = vcmask 523264   ;;  %vm355_vm3 = vcmask 58368  }
  0x15   :  { %411 = vmatprep.mubr.msk.bf16.mxu0 %vm521_vm0, %v520_v0  ;;  %419 = vmatprep.mubr.msk.bf16.mxu1 %vm521_vm0, %v520_v0  ;;  %v53_v5 = vld [vmem:[%s653_s1] sm:$0x1]  ;;  %v458_v8 = vld [vmem:[%s657_s5 + $0x8] sm:$0xff]   ;;  %v460_v10 = vld [vmem:[%s657_s5 + $0x18] sm:$0xff]  }
  0x16   :  { %408 = vmatpush3.bf16.msra.mxu0 %v453_v1  ;;  %416 = vmatpush3.bf16.msra.mxu1 %v454_v2  ;;  %v48_v6 = vld [vmem:[%s652_s0] sm:$0x1]  ;;  %v462_v25 = vld [vmem:[%s659_s7 + $0x8] sm:$0xff]   ;;  %v463_v26 = vld [vmem:[%s659_s7 + $0x10] sm:$0xff]  }
  0x17   :  { %409 = vmatprep.subr.bf16.mxu0 %v520_v0  ;;  %417 = vmatprep.subr.bf16.mxu1 %v520_v0  ;;  %v457_v7 = vld [vmem:[%s657_s5] sm:$0xff]   ;;  %v464_v27 = vld [vmem:[%s659_s7 + $0x18] sm:$0xff]  }
  0x18   :  { %v378_v13 = vld [vmem:[%s656_s4] ss:$0 sm:$0xff] }
  0x19   :  { %v461_v24 = vld [vmem:[%s659_s7] sm:$0xff]  }
  0x1a   :  { %410 = vmatpush3.bf16.msra.mxu0 %v455_v3  ;;  %418 = vmatpush3.bf16.msra.mxu1 %v456_v4  ;;  %v379_v28 = vld [vmem:[%s658_s6] ss:$0 sm:$0xff]  ;;  %s522_s6 = smov [#allocation5]  }
  0x1b   :  { %423 = vmatprep.subr.bf16.mxu0 %v520_v0  ;;  %435 = vmatprep.subr.bf16.mxu1 %v520_v0  ;;  %v385_v36 = vld [vmem:[%s660_s8] ss:$0 sm:$0xff]  ;;  %s363_s7 = sshll.u32 %s522_s6, 4  ;;  %s364_s7 = int_to_ptr.vmem [resolvable:$true] %s363_s7 }
  0x1c   :  { %s491_s26 = scalar_lea.vmem %s364_s7, 32  ;;  %p496_p9 = scmp.lt.s32.totalorder %s364_s7, %s364_s7 }
  0x1d   :  { %412 = vmatmul.mubr.msk.bf16.vlgmr.msra.gmra.mrb[0].mxu0 %vm70_vm1, %v53_v5  ;;  %420 = vmatmul.mubr.msk.bf16.vlgmr.msra.gmra.mrb[0].mxu1 %vm70_vm1, %v48_v6  ;;  %p492_p8 = scmp.ne.s32.totalorder %s364_s7, %s491_s26  ;;  %p497_p10 = scmp.lt.s32.totalorder %s491_s26, %s491_s26 }
  0x1e   :  { %431 = vmatprep.mubr.msk.bf16.mxu0 %vm521_vm0, %v520_v0  ;;  %443 = vmatprep.mubr.msk.bf16.mxu1 %vm521_vm0, %v520_v0 }
  0x1f   :  { %424 = vmatpush3.bf16.msra.mxu0 %v457_v7  ;;  %436 = vmatpush3.bf16.msra.mxu1 %v461_v24  ;;  %p498_p11 = por %p497_p10, %p496_p9 }
  0x20   :  { %425 = vmatprep.subr.bf16.mxu0 %v520_v0  ;;  %437 = vmatprep.subr.bf16.mxu1 %v520_v0 }
  0x21   :  { %p499_p12 = pnand %p498_p11, %p492_p8 }
  0x23   :  { %426 = vmatpush3.bf16.msra.mxu0 %v458_v8  ;;  %438 = vmatpush3.bf16.msra.mxu1 %v462_v25 }
  0x24   :  { %427 = vmatprep.subr.bf16.mxu0 %v520_v0  ;;  %439 = vmatprep.subr.bf16.mxu1 %v520_v0 }
  0x27   :  { %428 = vmatpush3.bf16.msra.mxu0 %v459_v9  ;;  %440 = vmatpush3.bf16.msra.mxu1 %v463_v26 }
  0x28   :  { %429 = vmatprep.subr.bf16.mxu0 %v520_v0  ;;  %441 = vmatprep.subr.bf16.mxu1 %v520_v0 }
  0x2b   :  { %430 = vmatpush3.bf16.msra.mxu0 %v460_v10  ;;  %442 = vmatpush3.bf16.msra.mxu1 %v464_v27 }
  0xf0   :  { %v108_v11 = vpop.f32.mrb[0].mxu0  ;;  %v163_v12 = vpop.f32.mrb[0].mxu1 }
  0xf1   :  { %v413_v14 = vpop.f32.mrb[1].mxu0  ;;  %v164_v15 = vadd.f32 %v163_v12, %v108_v11  ;;  %v421_v16 = vpop.f32.mrb[1].mxu1 }
  0xf2   :  { %v111_v17 = vpop.f32.mrb[2].mxu0  ;;  %v166_v18 = vpop.f32.mrb[2].mxu1 }
  0xf3   :  { %v414_v19 = vpop.f32.mrb[3].mxu0  ;;  %v176_v20 = vadd.f32 %v378_v13, %v164_v15  ;;  %v422_v21 = vpop.f32.mrb[3].mxu1 }
  0xf5   :  { %465 = vtanh.f32 %v176_v20 }
  0xff   :  { %v466_v22 = vpop.eup %465 }
 0x100   :  { %v178_v23 = vpack.c.bf16 %v466_v22, %v466_v22 }
 0x102   :  { %432 = vmatmul.mubr.msk.bf16.vlgmr.msra.gmra.mrb[4].mxu0 %vm218_vm2, %v178_v23 }
 0x1d5   :  { %v256_v29 = vpop.f32.mrb[4].mxu0 }
 0x1d6   :  { %v257_v30 = vadd.f32 %v379_v28, %v256_v29  ;;  %v433_v31 = vpop.f32.mrb[5].mxu0 }
 0x1d7   :  { %v259_v32 = vpop.f32.mrb[6].mxu0 }
 0x1d8   :  { %467 = vtanh.f32 %v257_v30  ;;  %v434_v33 = vpop.f32.mrb[7].mxu0 }
 0x1e2   :  { %v468_v34 = vpop.eup %467 }
 0x1e3   :  { %v263_v35 = vpack.c.bf16 %v468_v34, %v468_v34 }
 0x1e5   :  { %444 = vmatmul.mubr.msk.bf16.vlgmr.msra.gmra.mrb[4].mxu1 %vm218_vm2, %v263_v35 }
 0x2b8   :  { %v340_v37 = vpop.f32.mrb[4].mxu1 }
 0x2b9   :  { %v445_v38 = vpop.f32.mrb[5].mxu1  ;;  %v341_v39 = vadd.f32 %v385_v36, %v340_v37 }
 0x2ba   :  { %v343_v40 = vpop.f32.mrb[6].mxu1 }
 0x2bb   :  { %347 = vrot.lane.b32.xlu0 %v341_v39, %s518_s19  ;;  %v446_v41 = vpop.f32.mrb[7].mxu1 }
 0x32d   :  { %v348_v42 = vpop.permute.xlu0 %347 }
 0x32e   :  { %v350_v43 = vadd.f32 %v348_v42, %v176_v20 }
 0x330   :  { %352 = vrot.lane.b32.xlu0 %v350_v43, %s518_s19 }
 0x3a2   :  { %v353_v44 = vpop.permute.xlu0 %352 }
 0x3a3   :  { %356 = vst.msk [vmem:[#allocation5] sm:$0x3] %vm355_vm3, %v353_v44 }
 0x3a4   :  { %502 = shalt.err (!%p499_p12)
}
 0x3a5   :  { %s503_s28 = scalar_lea.hbm %s661_s9, 32 }
 0x3a6   :  { %p504_p13 = scmp.ne.s32.totalorder %s661_s9, %s503_s28  ;;  %p507_p0 = scmp.lt.u32.totalorder %s503_s28, %s661_s9 }
 0x3a8   :  { %p509_p1 = pnand %p507_p0, %p504_p13 }
 0x3aa   :  { %512 = shalt.err (!%p509_p1)
}
 0x3ab   :  { %366 = dma.vmem_to_hbm [thread:$0]  %s364_s7, 32, %s661_s9, [#allocation4]  }
 0x3ac   :  { %515 = dma.done.wait [#allocation4], 32  }
 0x3ad   :  { %516 = vsyncadd [#allocation4], 4294967264 }
 0x3ae   :  { %370 = vsyncpa [#allocation3], 1 }
 0x3af   :  { %371 = vsyncpa [#allocation4], 1 }

</bundles_post_ra>
